<compile_context>
chip_gen: v7x
topology: tpu7x:2x2x1
jax: 0.10.0
libtpu: 0.0.40
codegen_flags: <defaults>
</compile_context>

<pallas_src>
import functools

import jax
import jax.numpy as jnp
from jax.experimental import pallas as pl
from jax.experimental.pallas import tpu as pltpu

_LANE = 128
_NEG_INF = -1e30


def _round_up(v, m):
    return ((v + m - 1) // m) * m


def _vmem_limit_bytes():
    """Generation-aware VMEM limit (v5e/v6e: 128 MiB physical, v7x: 64 MiB)."""
    cap = 64 * 1024 * 1024  # conservative fallback (v7x-sized)
    try:
        info = pltpu.get_tpu_info()
        cap = int(getattr(info, "vmem_capacity_bytes", cap))
    except Exception:
        pass
    return max(32 * 1024 * 1024, (cap * 3) // 4)


def _pick_row_tile(num_nodes, f_out_pad, vmem_limit):
    """Largest row tile whose stage-2 working set fits the VMEM limit; the
    node count is then padded to a multiple of 2*TM so the parallel grid has
    an even number of steps (>= 2)."""
    n_est = _round_up(max(num_nodes, _LANE), _LANE)
    # Don't pick a tile that forces >~2x padding of the real node count.
    cap = max(_LANE, _round_up((n_est + 1) // 2, _LANE))
    for tm in (512, 256, 128):
        if tm > cap:
            continue
        n_pad = _round_up(max(num_nodes, 2 * tm), 2 * tm)
        est = (2 * tm * n_pad             # adj tile, int8, double buffered
               + n_pad * f_out_pad * 2    # h (bf16), single buffered
               + n_pad * 4                # a_src row (f32)
               + 4 * tm * n_pad * 4       # softmax temporaries (f32)
               + 2 * tm * f_out_pad * 4)  # out tile, double buffered
        if est <= vmem_limit:
            return tm, n_pad
    tm = _LANE
    return tm, _round_up(max(num_nodes, 2 * tm), 2 * tm)


def _invariant_spec(block_shape, index_map):
    """Grid-invariant block: request a single buffer (no wasted double-buffer
    VMEM). Falls back to the default spec if pipeline_mode is unsupported."""
    try:
        return pl.BlockSpec(block_shape, index_map, pipeline_mode=pl.Buffered(1))
    except Exception:
        return pl.BlockSpec(block_shape, index_map)


# --------------------------------------------------------------------------
# Stage 1: linear transform (bf16 MXU) + per-node source attention term.
# --------------------------------------------------------------------------
def _gat_transform_kernel(x_ref, w_ref, att_src_ref, h_ref, a_src_ref):
    # x: (TM, F_in_pad) f32, w: (F_in_pad, F_out_pad) f32, att_src: (1, F_out_pad)
    xb = x_ref[...].astype(jnp.bfloat16)
    wb = w_ref[...].astype(jnp.bfloat16)
    h = jnp.dot(xb, wb, preferred_element_type=jnp.float32)   # bf16 MXU, f32 acc
    h_ref[...] = h.astype(h_ref.dtype)                        # bf16 writeback
    # a_src produced directly as a (1, TM) row (lane axis = source nodes) so
    # the aggregation stage never needs a cross-lane transpose.
    a_src_ref[...] = jax.lax.dot_general(
        att_src_ref[...], h,
        dimension_numbers=(((1,), (1,)), ((), ())),
        preferred_element_type=jnp.float32)                    # (1, TM)


# --------------------------------------------------------------------------
# Stage 2: masked softmax over incoming edges + weighted aggregation,
# tiled over target-node rows. a_dst is recomputed from the resident h block.
# --------------------------------------------------------------------------
def _gat_aggregate_kernel(adj_ref, h_ref, a_src_ref, att_dst_ref, bias_ref,
                          out_ref, *, tm: int, apply_relu: bool):
    # adj: (TM, N_pad) int8, h: (N_pad, F_out_pad) bf16 (grid-invariant),
    # a_src: (1, N_pad) f32, att_dst/bias: (1, F_out_pad) f32.
    row0 = pl.multiple_of(pl.program_id(0) * tm, tm)
    h_tile = h_ref[pl.ds(row0, tm), :].astype(jnp.float32)            # (TM, F_out)
    a_dst = jnp.sum(h_tile * att_dst_ref[...], axis=-1, keepdims=True)  # (TM, 1)

    e = a_dst + a_src_ref[...]                                  # (TM, N_pad)
    e = jnp.maximum(e, 0.2 * e)                                 # LeakyReLU(0.2)

    # Masked softmax (self-loops guarantee every row has a valid entry).
    e = jnp.where(adj_ref[...] != 0, e, _NEG_INF)
    e_max = jnp.max(e, axis=-1, keepdims=True)
    p = jnp.exp(e - e_max)               # masked entries underflow to exactly 0
    denom = jnp.sum(p, axis=-1, keepdims=True)
    alpha = (p * pl.reciprocal(denom, approx=True)).astype(jnp.bfloat16)

    # Aggregate messages on the MXU (bf16 inputs, f32 accumulate).
    out = jnp.dot(alpha, h_ref[...], preferred_element_type=jnp.float32)
    out = out + bias_ref[...]
    if apply_relu:
        out = jnp.maximum(out, 0.0)
    out_ref[...] = out


def gat_conv(x, w, att_src, att_dst, bias, adj, *, tm, vmem_limit,
             apply_relu=False):
    """One single-head GATConv layer.

    x:   (N_pad, F_in_pad) float32, already node/feature padded.
    adj: (N_pad, N_pad) int8 mask with self-loops (adj[i, j] = 1 iff edge j->i).
    w/att_src/att_dst/bias are the unpadded layer parameters.
    Returns (N_pad, F_out_pad) float32.
    """
    n_pad, f_in_pad = x.shape
    f_in, f_out = w.shape
    f_out_pad = _round_up(f_out, _LANE)
    assert n_pad % tm == 0

    # Zero-pad parameters to lane-aligned shapes (zeros are exact no-ops).
    w_p = jnp.zeros((f_in_pad, f_out_pad), jnp.float32).at[:f_in, :f_out].set(w)
    att_src_p = jnp.zeros((1, f_out_pad), jnp.float32).at[:, :f_out].set(att_src)
    att_dst_p = jnp.zeros((1, f_out_pad), jnp.float32).at[:, :f_out].set(att_dst)
    bias_p = jnp.zeros((1, f_out_pad), jnp.float32).at[:, :f_out].set(bias)

    grid = (n_pad // tm,)
    cparams = pltpu.CompilerParams(
        dimension_semantics=("parallel",),
        vmem_limit_bytes=vmem_limit)

    # ---- Stage 1: h (bf16) + a_src (lane-major row) -------------------------
    h, a_src = pl.pallas_call(
        _gat_transform_kernel,
        out_shape=(
            jax.ShapeDtypeStruct((n_pad, f_out_pad), jnp.bfloat16),
            jax.ShapeDtypeStruct((1, n_pad), jnp.float32),
        ),
        grid=grid,
        in_specs=[
            pl.BlockSpec((tm, f_in_pad), lambda i: (i, 0)),
            _invariant_spec((f_in_pad, f_out_pad), lambda i: (0, 0)),
            _invariant_spec((1, f_out_pad), lambda i: (0, 0)),
        ],
        out_specs=(
            pl.BlockSpec((tm, f_out_pad), lambda i: (i, 0)),
            pl.BlockSpec((1, tm), lambda i: (0, i)),
        ),
        compiler_params=cparams,
    )(x, w_p, att_src_p)

    # ---- Stage 2: masked softmax + aggregation, tiled over target rows -----
    kernel = functools.partial(_gat_aggregate_kernel, tm=tm,
                               apply_relu=apply_relu)
    out = pl.pallas_call(
        kernel,
        out_shape=jax.ShapeDtypeStruct((n_pad, f_out_pad), jnp.float32),
        grid=grid,
        in_specs=[
            pl.BlockSpec((tm, n_pad), lambda i: (i, 0)),             # adj (int8)
            _invariant_spec((n_pad, f_out_pad), lambda i: (0, 0)),   # h (bf16)
            _invariant_spec((1, n_pad), lambda i: (0, 0)),           # a_src
            _invariant_spec((1, f_out_pad), lambda i: (0, 0)),       # att_dst
            _invariant_spec((1, f_out_pad), lambda i: (0, 0)),       # bias
        ],
        out_specs=pl.BlockSpec((tm, f_out_pad), lambda i: (i, 0)),
        compiler_params=cparams,
    )(adj, h, a_src, att_dst_p, bias_p)
    return out


def glorot(key, shape):
    fan_in, fan_out = shape[0], shape[-1]
    limit = jnp.sqrt(6.0 / (fan_in + fan_out))
    return jax.random.uniform(key, shape, jnp.float32, -limit, limit)


def init_gat_params(key, num_features, hidden_channels, num_classes):
    ks = jax.random.split(key, 6)
    return {
        # Layer 1: num_features -> hidden_channels
        "w1": glorot(ks[0], (num_features, hidden_channels)),
        "att_src1": glorot(ks[1], (1, hidden_channels)),
        "att_dst1": glorot(ks[2], (1, hidden_channels)),
        "b1": jnp.zeros((1, hidden_channels), jnp.float32),
        # Layer 2: hidden_channels -> num_classes
        "w2": glorot(ks[3], (hidden_channels, num_classes)),
        "att_src2": glorot(ks[4], (1, num_classes)),
        "att_dst2": glorot(ks[5], (1, num_classes)),
        "b2": jnp.zeros((1, num_classes), jnp.float32),
    }


def edge_index_to_adj(edge_index, num_nodes_padded):
    """Dense int8 adjacency: adj[i, j] = 1 iff edge j -> i, plus self-loops on
    every (including padded) node so each softmax row is well-defined."""
    src, dst = edge_index[0], edge_index[1]
    adj = jnp.zeros((num_nodes_padded, num_nodes_padded), jnp.int8)
    adj = adj.at[dst, src].set(1)
    diag = jnp.arange(num_nodes_padded)
    adj = adj.at[diag, diag].set(1)
    return adj


def gat_forward(params, x, edge_index):
    """conv1 -> relu (fused) -> conv2, on lane/row-padded inputs."""
    num_nodes, num_features = x.shape
    num_classes = params["w2"].shape[1]
    f_out_pad = _round_up(max(params["w1"].shape[1], num_classes), _LANE)
    vmem_limit = _vmem_limit_bytes()
    tm, n_pad = _pick_row_tile(num_nodes, f_out_pad, vmem_limit)

    f_in_pad = _round_up(num_features, _LANE)
    adj = edge_index_to_adj(edge_index, n_pad)                 # (n_pad, n_pad) int8
    x_pad = jnp.zeros((n_pad, f_in_pad), jnp.float32)
    x_pad = x_pad.at[:num_nodes, :num_features].set(x)

    h = gat_conv(x_pad, params["w1"], params["att_src1"], params["att_dst1"],
                 params["b1"], adj, tm=tm, vmem_limit=vmem_limit,
                 apply_relu=True)
    out = gat_conv(h, params["w2"], params["att_src2"], params["att_dst2"],
                   params["b2"], adj, tm=tm, vmem_limit=vmem_limit,
                   apply_relu=False)
    return out[:num_nodes, :num_classes]                       # strip padding


if __name__ == "__main__":
    # Small synthetic "Cora-like" graph.
    num_nodes = 32
    num_features = 16
    hidden_channels = 8
    num_classes = 4
    num_edges = 96

    key = jax.random.PRNGKey(0)
    k_x, k_e1, k_e2, k_p = jax.random.split(key, 4)

    x = jax.random.normal(k_x, (num_nodes, num_features), jnp.float32)
    # Row-normalize features (NormalizeFeatures transform analogue).
    x = x / jnp.maximum(jnp.sum(jnp.abs(x), axis=-1, keepdims=True), 1e-12)

    src = jax.random.randint(k_e1, (num_edges,), 0, num_nodes)
    dst = jax.random.randint(k_e2, (num_edges,), 0, num_nodes)
    edge_index = jnp.stack([src, dst], axis=0)                 # (2, E), like PyG

    params = init_gat_params(k_p, num_features, hidden_channels, num_classes)

    out = gat_forward(params, x, edge_index)
    out = jax.block_until_ready(out)
    assert out.shape == (num_nodes, num_classes)
    assert bool(jnp.all(jnp.isfinite(out)))
    print("KERNEL_OK")
</pallas_src>

<mosaic_0001>
module attributes {stable_mosaic.version = 11 : i64} {
  func.func @_gat_transform_kernel(%arg0: i32, %arg1: memref<128x128xf32, #tpu.memory_space<vmem>>, %arg2: memref<128x128xf32, #tpu.memory_space<vmem>>, %arg3: memref<1x128xf32, #tpu.memory_space<vmem>>, %arg4: memref<128x128xbf16, #tpu.memory_space<vmem>>, %arg5: memref<1x128xf32, #tpu.memory_space<vmem>>) attributes {dimension_semantics = [#tpu.dimension_semantics<parallel>], iteration_bounds = array<i64: 2>, scalar_prefetch = 0 : i64, scratch_operands = 0 : i64, tpu.core_type = #tpu.core_type<tc>, window_params = [{transform_indices = @transform_0, window_bounds = array<i64: 128, 128>}, {pipeline_mode = #tpu.pipeline_mode<synchronous>, transform_indices = @transform_1, window_bounds = array<i64: 128, 128>}, {pipeline_mode = #tpu.pipeline_mode<synchronous>, transform_indices = @transform_2, window_bounds = array<i64: 1, 128>}, {transform_indices = @transform_3, window_bounds = array<i64: 128, 128>}, {transform_indices = @transform_4, window_bounds = array<i64: 1, 128>}]} {
    %c0 = arith.constant 0 : index
    %c0_0 = arith.constant 0 : index
    %0 = vector.load %arg1[%c0, %c0_0] : memref<128x128xf32, #tpu.memory_space<vmem>>, vector<128x128xf32>
    %1 = arith.truncf %0 : vector<128x128xf32> to vector<128x128xbf16>
    %c0_1 = arith.constant 0 : index
    %c0_2 = arith.constant 0 : index
    %2 = vector.load %arg2[%c0_1, %c0_2] : memref<128x128xf32, #tpu.memory_space<vmem>>, vector<128x128xf32>
    %3 = arith.truncf %2 : vector<128x128xf32> to vector<128x128xbf16>
    %cst = arith.constant dense<0.000000e+00> : vector<128x128xf32>
    %4 = tpu.matmul %1, %3, %cst {dimension_numbers = #tpu.dot_dimension_numbers<[1], [0], [0], [1], [0, 0, 1, 1], [], []>} : vector<128x128xbf16>, vector<128x128xbf16>, vector<128x128xf32> -> vector<128x128xf32>
    %5 = arith.truncf %4 : vector<128x128xf32> to vector<128x128xbf16>
    %c0_3 = arith.constant 0 : index
    %c0_4 = arith.constant 0 : index
    %6 = vector.load %arg4[%c0_3, %c0_4] : memref<128x128xbf16, #tpu.memory_space<vmem>>, vector<128x128xbf16>
    tpu.vector_store %arg4[%c0_3, %c0_4], %5 {strides = array<i32>} : memref<128x128xbf16, #tpu.memory_space<vmem>>, vector<128x128xbf16>,
    %c0_5 = arith.constant 0 : index
    %c0_6 = arith.constant 0 : index
    %7 = vector.load %arg3[%c0_5, %c0_6] : memref<1x128xf32, #tpu.memory_space<vmem>>, vector<1x128xf32>
    %cst_7 = arith.constant dense<0.000000e+00> : vector<1x128xf32>
    %8 = tpu.matmul %7, %4, %cst_7 {dimension_numbers = #tpu.dot_dimension_numbers<[1], [1], [0], [0], [0, 0, 1, 0], [], []>} : vector<1x128xf32>, vector<128x128xf32>, vector<1x128xf32> -> vector<1x128xf32>
    %c0_8 = arith.constant 0 : index
    %c0_9 = arith.constant 0 : index
    %9 = vector.load %arg5[%c0_8, %c0_9] : memref<1x128xf32, #tpu.memory_space<vmem>>, vector<1x128xf32>
    tpu.vector_store %arg5[%c0_8, %c0_9], %8 {strides = array<i32>} : memref<1x128xf32, #tpu.memory_space<vmem>>, vector<1x128xf32>,
    return
  }
  func.func @transform_0(%arg0: i32) -> (i32, i32) {
    %c0_i32 = arith.constant 0 : i32
    %c0_i32_0 = arith.constant 0 : i32
    return %arg0, %c0_i32 : i32, i32
  }
  func.func @transform_1(%arg0: i32) -> (i32, i32) {
    %c0_i32 = arith.constant 0 : i32
    %c0_i32_0 = arith.constant 0 : i32
    %c0_i32_1 = arith.constant 0 : i32
    return %c0_i32, %c0_i32_0 : i32, i32
  }
  func.func @transform_2(%arg0: i32) -> (i32, i32) {
    %c0_i32 = arith.constant 0 : i32
    %c0_i32_0 = arith.constant 0 : i32
    %c0_i32_1 = arith.constant 0 : i32
    return %c0_i32, %c0_i32_0 : i32, i32
  }
  func.func @transform_3(%arg0: i32) -> (i32, i32) {
    %c0_i32 = arith.constant 0 : i32
    %c0_i32_0 = arith.constant 0 : i32
    return %arg0, %c0_i32 : i32, i32
  }
  func.func @transform_4(%arg0: i32) -> (i32, i32) {
    %c0_i32 = arith.constant 0 : i32
    %c0_i32_0 = arith.constant 0 : i32
    return %c0_i32, %arg0 : i32, i32
  }
}

</mosaic_0001>

<bundles_post_ra>
// kernel: tpu_custom_call.1
= control target key start
LH: loop header
LB: loop body
LE: loop exit
PB: predicated region body
PF: predicated region fallthrough
CT: control target
= control target key end

     0   :  { %10 = vsyncpa [#allocation3], 0  ;;  %s1443_s0 = inlined_call_operand.hbm [shape: f32[256,128], index: 0, kind: input, shape index: {}]   ;;  %s1444_s1 = inlined_call_operand.hbm [shape: f32[128,128], index: 1, kind: input, shape index: {}]   ;;  %s1445_s2 = inlined_call_operand.vmem [shape: f32[1,128], index: 2, kind: input, shape index: {}]   ;;  %s1446_s3 = inlined_call_operand.hbm [shape: bf16[256,128], index: 3, kind: output, shape index: {0}]   ;;  %s1447_s4 = inlined_call_operand.hbm [shape: f32[1,256], index: 4, kind: output, shape index: {1}]  }
   0x1   :  { %12 = vsyncpa [#allocation3 + $0x1], 0 }
   0x2   :  { %13 = vsyncpa [#allocation6], 0 }
   0x3   :  { %14 = vsyncpa [#allocation4], 0 }
   0x4   :  { %16 = vsyncpa [#allocation4 + $0x1], 0 }
   0x5   :  { %17 = vsyncpa [#allocation9], 0 }
   0x6   :  { %19 = vsyncpa [#allocation9 + $0x1], 0  ;;  %s1172_s15 = smov 0   ;;  %s1174_s16 = smov 0  }
   0x7   :  { %s1176_s17 = smov 0   ;;  %s1178_s18 = smov 0  }
   0x8 LB: > { %s1193_s19 = sadd.s32 4294967295, %s1134_s18   ;;  %s683_s20 = sadd.s32 4294967294, %s1134_s18   ;;  %s1134_s18 = sphi %s1178_s18, %s1467_s18   ;;  %s1130_s17 = sphi %s1176_s17, %s1466_s17   ;;  %s1126_s16 = sphi %s1174_s16, %s1465_s16   ;;  %s1122_s15 = sphi %s1172_s15, %s1464_s15  }
   0x9   : > { %p45_p0 = scmp.ne.s32.totalorder %s1126_s16, %s1122_s15  ;;  %p1448_p1 = scmp.eq.s32.totalorder %s1193_s19, 0 }
   0xa   : > { %p117_p3 = scmp.eq.s32.totalorder %s683_s20, 1  ;;  %p684_p5 = scmp.ge.s32.totalorder %s1134_s18, 1 }
   0xb   : > { %p1202_p4 = por %p1448_p1, %p45_p0  ;;  %p150_p7 = scmp.lt.s32.totalorder %s1134_s18, 3 }
   0xc   : > { %p1207_p6 = por %p117_p3, %p45_p0  ;;  %s1136_s24 = smov [#allocation5]  }
   0xd   : > { %s1451_s21 = scalar_select %p1202_p4, 1, 0 }
   0xe   : > { %s1452_s22 = scalar_select %p1207_p6, 1, 0 }
   0xf   : > { %p1212_p8 = pnand %p684_p5, %p150_p7  ;;  %s162_s25 = sshll.u32 %s1136_s24, 4  ;;  %s1216_s25 = int_to_ptr.vmem [resolvable:$true] %s162_s25 }
  0x10   : > { %s1228_s27 = sadd.s32 1, %s1134_s18   ;;  %s32_s28 = sadd.s32 1, %s1130_s17 }
  0x11   : > { %s1453_s23 = scalar_select %p1212_p8, 1, 0 }
  0x12   : > { %p915_p9 = pneg %p1212_p8  ;;  %s29_s29 = ssub.s32 %s1134_s18, %s1228_s27 }
  0x13   : > { %s974_s6 = scalar_lea.hbm %s1444_s1, 2048 }
  0x14   : > { %p1223_p11 = pnand %p915_p9, %p1448_p1  ;;  %p975_p12 = scmp.ne.s32.totalorder %s1444_s1, %s974_s6 }
  0x15   : > { %p981_p5 = scmp.lt.u32.totalorder %s974_s6, %s1444_s1 }
  0x16   : > { %p976_p13 = pneg %p1223_p11 }
  0x18   : > { %p977_p0 = pnand %p976_p13, %p975_p12 }
  0x1a   : > { %p978_p3 = pneg %p977_p0 }
  0x1c   : > { %p983_p7 = pnand %p981_p5, %p978_p3 }
  0x1e   : > { %986 = shalt.err (!%p983_p7)
}
  0x1f   : > { %s987_s11 = scalar_lea.vmem %s1216_s25, 2048  ;;  %p995_p2 = scmp.lt.s32.totalorder %s1216_s25, %s1216_s25 }
  0x20   : > { %p988_p9 = scmp.ne.s32.totalorder %s1216_s25, %s987_s11  ;;  %p996_p6 = scmp.lt.s32.totalorder %s987_s11, %s987_s11 }
  0x22   : > { %p990_p10 = pnand %p988_p9, %p976_p13  ;;  %p997_p4 = por %p996_p6, %p995_p2 }
  0x24   : > { %p991_p1 = pneg %p990_p10 }
  0x26   : > { %p998_p8 = pnand %p997_p4, %p991_p1 }
  0x28   : > { %1001 = shalt.err (!%p998_p8)
}
  0x29   : > { %s1137_s12 = smov 128   ;;  %s1138_s13 = smov 8  }
  0x2a   : > { %918 = dma.hbm_to_vmem [thread:$0]  (!%p1223_p11), %s1444_s1, 2048, %s1216_s25, [#allocation6], %s1137_s12, %s1137_s12, %s1138_s13  }
  0x2b   : > { %p30_p1 = scmp.eq.s32.totalorder %s29_s29, 0  ;;  %p39_p2 = scmp.ne.s32.totalorder %s1130_s17, %s1126_s16 }
  0x2c   : > { %p40_p4 = scmp.eq.s32.totalorder %s1134_s18, 0  ;;  %p931_p6 = scmp.lt.s32.totalorder %s1134_s18, 2 }
  0x2d   : > { %s1262_s24 = scalar_select %p30_p1, %s1130_s17, %s32_s28  }
  0x2e   : > { %p41_p8 = por %p40_p4, %p39_p2  ;;  %p1455_p10 = scmp.eq.s32.totalorder %s1193_s19, 1 }
  0x2f   : > { %s179_s26 = sand.u32 1, %s1130_s17   ;;  %s716_s5 = sshll.u32 %s1134_s18, 11 }
  0x30   : > { %p1266_p12 = por %p1455_p10, %p39_p2  ;;  %s687_s6 = sshll.u32 %s179_s26, 7 }
  0x31   : > { %s1275_s9 = scalar_lea.hbm %s1443_s0, %s716_s5  ;;  %s183_s25 = scalar_lea.vmem [#allocation2], %s687_s6 }
  0x32   : > { %s190_s28 = sshll.u32 %s183_s25, 4  ;;  %p1277_p11 = pnand %p931_p6, %p41_p8  ;;  %s1281_s28 = int_to_ptr.vmem [resolvable:$true] %s190_s28 }
  0x33   : > { %s1283_s10 = scalar_lea.sflag [#allocation3], %s179_s26  ;;  %s1002_s11 = scalar_lea.hbm %s1275_s9, 2048 }
  0x34   : > { %p1003_p13 = scmp.ne.s32.totalorder %s1275_s9, %s1002_s11  ;;  %p1004_p0 = pneg %p1277_p11 }
  0x35   : > { %s1007_s5 = scalar_lea.hbm %s1443_s0, 4096  ;;  %p1008_p7 = scmp.lt.u32.totalorder %s1275_s9, %s1443_s0 }
  0x36   : > { %p1005_p3 = pnand %p1004_p0, %p1003_p13  ;;  %p1009_p9 = scmp.lt.u32.totalorder %s1007_s5, %s1002_s11 }
  0x37   : > { %p1011_p2 = scmp.lt.u32.totalorder %s1002_s11, %s1275_s9 }
  0x38   : > { %p1006_p5 = pneg %p1005_p3  ;;  %p1010_p1 = por %p1009_p9, %p1008_p7 }
  0x3a   : > { %p1012_p4 = por %p1011_p2, %p1010_p1 }
  0x3c   : > { %p1013_p6 = pnand %p1012_p4, %p1006_p5 }
  0x3e   : > { %1016 = shalt.err (!%p1013_p6)
}
  0x3f   : > { %s1017_s26 = scalar_lea.vmem %s1281_s28, 2048  ;;  %s1139_s8 = smov [#allocation2]  }
  0x40   : > { %p1018_p8 = scmp.ne.s32.totalorder %s1281_s28, %s1017_s26  ;;  %s1022_s25 = sshll.u32 %s1139_s8, 4  ;;  %s1023_s25 = int_to_ptr.vmem [resolvable:$false] %s1022_s25 }
  0x41   : > { %s1024_s14 = scalar_lea.vmem %s1023_s25, 4096  ;;  %p1025_p3 = scmp.lt.s32.totalorder %s1281_s28, %s1023_s25 }
  0x42   : > { %p1020_p10 = pnand %p1018_p8, %p1004_p0  ;;  %p1026_p7 = scmp.lt.s32.totalorder %s1024_s14, %s1017_s26 }
  0x44   : > { %p1021_p13 = pneg %p1020_p10  ;;  %p1027_p9 = por %p1026_p7, %p1025_p3 }
  0x46   : > { %p1028_p1 = pnand %p1027_p9, %p1021_p13 }
  0x48   : > { %1031 = shalt.err (!%p1028_p1)
}
  0x49   : > { %922 = dma.hbm_to_vmem [thread:$0]  (!%p1277_p11), %s1275_s9, 2048, %s1281_s28, %s1283_s10, %s1137_s12, %s1137_s12, %s1138_s13  }
  0x4a   : > { %p1458_p0 = scmp.ne.s32.totalorder %s1453_s23, 0 }
  0x4b   : > { %s1317_s11 = sand.u32 (!%p1458_p0), 1, %s1126_s16   ;;  %p1459_p5 = scmp.ne.s32.totalorder (!%p1458_p0), %s1451_s21, 0 }
  0x4c   : > { %202 = sbr.rel (%p1458_p0) target bundleno = 628 (0x274), region = 32  ;;  %s691_s20 = sshll.u32 (!%p1458_p0), %s1317_s11, 7 }
  0x4d   : > { %s205_s5 = scalar_lea.sflag (!%p1458_p0), [#allocation3], %s1317_s11  ;;  %s1321_s6 = scalar_lea.vmem (!%p1458_p0), [#allocation2], %s691_s20 }
  0x53   : > { %1105 = dma.done.wait (%p1459_p5), %s205_s5, 2048  }
  0x54   : > { %1107 = vsyncadd (%p1459_p5), %s205_s5, 4294965248  ;;  %p1460_p11 = scmp.eq.s32.totalorder %s1193_s19, 0 }
  0x56   : > { %1109 = dma.done.wait (%p1460_p11), [#allocation6], 2048   ;;  %p1461_p2 = pmov %p1460_p11 }
  0x57   : > { %v268_v0 = vld [vmem:[#allocation5] sm:$0xff]  ;;  %v269_v1 = vld [vmem:[#allocation5 + $0x8] sm:$0xff]  ;;  %v270_v2 = vld [vmem:[#allocation5 + $0x10] sm:$0xff]  ;;  %v1140_v48 = vmov 0.0|0.0   ;;  %vm1141_vm0 = vmmov 0   ;;  %v1142_v49 = vmov 0.0  }
  0x58   : > { %1111 = vsyncadd (%p1461_p2), [#allocation6], 4294965248  ;;  %v284_v3 = vpack.c.bf16 %v269_v1, %v268_v0  ;;  %v271_v4 = vld [vmem:[#allocation5 + $0x18] sm:$0xff]  ;;  %v272_v6 = vld [vmem:[#allocation5 + $0x20] sm:$0xff]  ;;  %881 = vmatprep.subr.bf16.mxu1 %v1140_v48  ;;  %878 = vmatprep.mubr.msk.f32.mxu1 %vm1141_vm0, %v1142_v49  ;;  %s693_s21 = sshll.u32 %s1317_s11, 6  ;;  %s733_s28 = sshll.u32 %s1193_s19, 10 }
  0x59   : > { %v285_v5 = vpack.c.bf16 %v271_v4, %v270_v2  ;;  %v273_v7 = vld [vmem:[#allocation5 + $0x28] sm:$0xff]  ;;  %v244_v9 = vld [vmem:[%s1321_s6] sm:$0xff]  ;;  %v274_v11 = vld [vmem:[#allocation5 + $0x30] sm:$0xff]  ;;  %s1348_s23 = scalar_lea.vmem [#allocation7], %s693_s21  ;;  %s1368_s7 = scalar_lea.hbm %s1446_s3, %s733_s28 }
  0x5a   : > { %814 = vmatprep.subr.bf16.mxu0 %v284_v3  ;;  %v286_v8 = vpack.c.bf16 %v273_v7, %v272_v6  ;;  %v245_v10 = vld [vmem:[%s1321_s6 + $0x8] sm:$0xff]  ;;  %v275_v12 = vld [vmem:[#allocation5 + $0x38] sm:$0xff]  ;;  %v276_v15 = vld [vmem:[#allocation5 + $0x40] sm:$0xff]  ;;  %s559_s9 = sshll.u32 %s1348_s23, 4  ;;  %s542_s26 = scalar_lea.sflag [#allocation4], %s1317_s11  ;;  %s1363_s9 = int_to_ptr.vmem [resolvable:$true] %s559_s9 }
  0x5b   : > { %815 = vmatpush3.bf16.msra.mxu0 %v284_v3  ;;  %v260_v13 = vpack.c.bf16 %v245_v10, %v244_v9  ;;  %v287_v14 = vpack.c.bf16 %v275_v12, %v274_v11  ;;  %v277_v16 = vld [vmem:[#allocation5 + $0x48] sm:$0xff]  ;;  %v278_v18 = vld [vmem:[#allocation5 + $0x50] sm:$0xff]  ;;  %v279_v19 = vld [vmem:[#allocation5 + $0x58] sm:$0xff]  ;;  %s1032_s8 = scalar_lea.vmem %s1363_s9, 1024  ;;  %s1143_s25 = smov [#allocation7]  }
  0x5c   : > { %816 = vmatprep.subr.bf16.mxu0 %v285_v5  ;;  %v288_v17 = vpack.c.bf16 %v277_v16, %v276_v15  ;;  %v289_v20 = vpack.c.bf16 %v279_v19, %v278_v18  ;;  %v280_v21 = vld [vmem:[#allocation5 + $0x60] sm:$0xff]  ;;  %v281_v22 = vld [vmem:[#allocation5 + $0x68] sm:$0xff]  ;;  %v282_v24 = vld [vmem:[#allocation5 + $0x70] sm:$0xff]  ;;  %p1033_p4 = scmp.ne.s32.totalorder %s1363_s9, %s1032_s8  ;;  %s1036_s14 = sshll.u32 %s1143_s25, 4  ;;  %s1037_s14 = int_to_ptr.vmem [resolvable:$false] %s1036_s14 }
  0x5d   : > { %830 = vmatprep.mubr.bf16.mxu0 %v260_v13  ;;  %v290_v23 = vpack.c.bf16 %v281_v22, %v280_v21  ;;  %v283_v25 = vld [vmem:[#allocation5 + $0x78] sm:$0xff]  ;;  %v246_v27 = vld [vmem:[%s1321_s6 + $0x10] sm:$0xff]  ;;  %v248_v29 = vld [vmem:[%s1321_s6 + $0x20] sm:$0xff]  ;;  %s1038_s20 = scalar_lea.vmem %s1037_s14, 2048  ;;  %p1039_p10 = scmp.lt.s32.totalorder %s1363_s9, %s1037_s14 }
  0x5e   : > { %v291_v26 = vpack.c.bf16 %v283_v25, %v282_v24  ;;  %v247_v28 = vld [vmem:[%s1321_s6 + $0x18] sm:$0xff]  ;;  %v249_v30 = vld [vmem:[%s1321_s6 + $0x28] sm:$0xff]  ;;  %v250_v33 = vld [vmem:[%s1321_s6 + $0x30] sm:$0xff]  ;;  %p1034_p6 = pnand %p1033_p4, %p1266_p12  ;;  %p1040_p13 = scmp.lt.s32.totalorder %s1038_s20, %s1032_s8 }
  0x5f   : > { %817 = vmatpush3.bf16.msra.mxu0 %v285_v5  ;;  %v261_v31 = vpack.c.bf16 %v247_v28, %v246_v27  ;;  %v262_v32 = vpack.c.bf16 %v249_v30, %v248_v29  ;;  %v251_v34 = vld [vmem:[%s1321_s6 + $0x38] sm:$0xff]  ;;  %v252_v35 = vld [vmem:[%s1321_s6 + $0x40] sm:$0xff]  ;;  %v253_v36 = vld [vmem:[%s1321_s6 + $0x48] sm:$0xff] }
  0x60   : > { %818 = vmatprep.subr.bf16.mxu0 %v286_v8  ;;  %v263_v37 = vpack.c.bf16 %v251_v34, %v250_v33  ;;  %v264_v38 = vpack.c.bf16 %v253_v36, %v252_v35  ;;  %v254_v39 = vld [vmem:[%s1321_s6 + $0x50] sm:$0xff]  ;;  %v255_v40 = vld [vmem:[%s1321_s6 + $0x58] sm:$0xff]  ;;  %v256_v41 = vld [vmem:[%s1321_s6 + $0x60] sm:$0xff]  ;;  %p1035_p8 = pneg %p1034_p6  ;;  %p1041_p3 = por %p1040_p13, %p1039_p10 }
  0x61   : > { %v257_v42 = vld [vmem:[%s1321_s6 + $0x68] sm:$0xff]  ;;  %v265_v43 = vpack.c.bf16 %v255_v40, %v254_v39  ;;  %v258_v45 = vld [vmem:[%s1321_s6 + $0x70] sm:$0xff]  ;;  %v259_v46 = vld [vmem:[%s1321_s6 + $0x78] sm:$0xff] }
  0x62   : > { %v266_v44 = vpack.c.bf16 %v257_v42, %v256_v41  ;;  %v267_v47 = vpack.c.bf16 %v259_v46, %v258_v45  ;;  %v469_v10 = vld [vmem:[%s1445_s2] sm:$0x1]  ;;  %p1042_p7 = pnand %p1041_p3, %p1035_p8 }
  0x63   : > { %819 = vmatpush3.bf16.msra.mxu0 %v286_v8 }
  0x64   : > { %820 = vmatprep.subr.bf16.mxu0 %v287_v14 }
  0x67   : > { %821 = vmatpush3.bf16.msra.mxu0 %v287_v14 }
  0x68   : > { %822 = vmatprep.subr.bf16.mxu0 %v288_v17 }
  0x6b   : > { %823 = vmatpush3.bf16.msra.mxu0 %v288_v17 }
  0x6c   : > { %824 = vmatprep.subr.bf16.mxu0 %v289_v20 }
  0x6f   : > { %825 = vmatpush3.bf16.msra.mxu0 %v289_v20 }
  0x70   : > { %826 = vmatprep.subr.bf16.mxu0 %v290_v23 }
  0x73   : > { %827 = vmatpush3.bf16.msra.mxu0 %v290_v23 }
  0x74   : > { %828 = vmatprep.subr.bf16.mxu0 %v291_v26 }
  0x77   : > { %829 = vmatpush3.bf16.msra.mxu0 %v291_v26 }
  0x7a   : > { %831 = vmatmul.mubr.bf16.vlgmr.msra.gmra.mrb[0].mxu0 %v261_v31 }
  0x7b   : > { %834 = vmatprep.mubr.bf16.mxu0 %v262_v32 }
  0x82   : > { %835 = vmatmul.mubr.bf16.gmra.mrb[4].mxu0 %v263_v37 }
  0x83   : > { %838 = vmatprep.mubr.bf16.mxu0 %v264_v38 }
  0x8a   : > { %839 = vmatmul.mubr.bf16.gmra.mrb[8].mxu0 %v265_v43 }
  0x8b   : > { %842 = vmatprep.mubr.bf16.mxu0 %v266_v44 }
  0x92   : > { %843 = vmatmul.mubr.bf16.gmra.mrb[12].mxu0 %v267_v47 }
 0x14d   : > { %v832_v50 = vpop.f32.mrb[0].mxu0 }
 0x14e   : > { %v326_v51 = vpop.f32.mrb[1].mxu0 }
 0x14f   : > { %v833_v52 = vpop.f32.mrb[2].mxu0 }
 0x150   : > { %v742_v53 = vpack.c.bf16 %v833_v52, %v832_v50  ;;  %v329_v54 = vpop.f32.mrb[3].mxu0 }
 0x151   : > { %v737_v55 = vpack.c.bf16 %v329_v54, %v326_v51 }
 0x152   : > { %774 = vst [vmem:[%s1348_s23 + $0x8] sm:$0xff] %v742_v53  }
 0x153   : > { %738 = vst [vmem:[%s1348_s23] sm:$0xff] %v737_v55   ;;  %883 = vmatpush3.bf16.xpose.msra.mxu1 %v737_v55 }
 0x154   : > { %884 = vmatprep.subr.bf16.mxu1 %v1140_v48 }
 0x155   : > { %v836_v56 = vpop.f32.mrb[4].mxu0 }
 0x156   : > { %v342_v57 = vpop.f32.mrb[5].mxu0 }
 0x157   : > { %v837_v58 = vpop.f32.mrb[6].mxu0 }
 0x158   : > { %v752_v59 = vpack.c.bf16 %v837_v58, %v836_v56  ;;  %v345_v60 = vpop.f32.mrb[7].mxu0 }
 0x159   : > { %v747_v61 = vpack.c.bf16 %v345_v60, %v342_v57 }
 0x15a   : > { %776 = vst [vmem:[%s1348_s23 + $0x18] sm:$0xff] %v752_v59  }
 0x15b   : > { %886 = vmatpush3.bf16.xpose.msra.mxu1 %v742_v53  ;;  %775 = vst [vmem:[%s1348_s23 + $0x10] sm:$0xff] %v747_v61  }
 0x15c   : > { %887 = vmatprep.subr.bf16.mxu1 %v1140_v48 }
 0x15d   : > { %v840_v62 = vpop.f32.mrb[8].mxu0 }
 0x15e   : > { %v358_v63 = vpop.f32.mrb[9].mxu0 }
 0x15f   : > { %v841_v0 = vpop.f32.mrb[10].mxu0 }
 0x160   : > { %v762_v1 = vpack.c.bf16 %v841_v0, %v840_v62  ;;  %v361_v2 = vpop.f32.mrb[11].mxu0 }
 0x161   : > { %v757_v3 = vpack.c.bf16 %v361_v2, %v358_v63 }
 0x162   : > { %778 = vst [vmem:[%s1348_s23 + $0x28] sm:$0xff] %v762_v1  }
 0x163   : > { %889 = vmatpush3.bf16.xpose.msra.mxu1 %v747_v61  ;;  %777 = vst [vmem:[%s1348_s23 + $0x20] sm:$0xff] %v757_v3  }
 0x164   : > { %890 = vmatprep.subr.bf16.mxu1 %v1140_v48 }
 0x165   : > { %v844_v4 = vpop.f32.mrb[12].mxu0 }
 0x166   : > { %v374_v5 = vpop.f32.mrb[13].mxu0 }
 0x167   : > { %v845_v6 = vpop.f32.mrb[14].mxu0 }
 0x168   : > { %v772_v7 = vpack.c.bf16 %v845_v6, %v844_v4  ;;  %v377_v8 = vpop.f32.mrb[15].mxu0 }
 0x169   : > { %v767_v9 = vpack.c.bf16 %v377_v8, %v374_v5 }
 0x16a   : > { %780 = vst [vmem:[%s1348_s23 + $0x38] sm:$0xff] %v772_v7  }
 0x16b   : > { %892 = vmatpush3.bf16.xpose.msra.mxu1 %v752_v59  ;;  %779 = vst [vmem:[%s1348_s23 + $0x30] sm:$0xff] %v767_v9  }
 0x16c   : > { %893 = vmatprep.subr.bf16.mxu1 %v1140_v48 }
 0x173   : > { %895 = vmatpush3.bf16.xpose.msra.mxu1 %v757_v3 }
 0x174   : > { %896 = vmatprep.subr.bf16.mxu1 %v1140_v48 }
 0x17b   : > { %898 = vmatpush3.bf16.xpose.msra.mxu1 %v762_v1 }
 0x17c   : > { %899 = vmatprep.subr.bf16.mxu1 %v1140_v48 }
 0x183   : > { %901 = vmatpush3.bf16.xpose.msra.mxu1 %v767_v9 }
 0x184   : > { %902 = vmatprep.subr.bf16.mxu1 %v1140_v48 }
 0x18b   : > { %904 = vmatpush3.bf16.xpose.msra.mxu1 %v772_v7 }
 0x192   : > { %879 = vmatmul.mubr.f32.vlgmr.msra.gmra.mrb[0].mxu1 %v469_v10 }
 0x193   : > { %1045 = shalt.err (!%p1042_p7)
}
 0x194   : > { %s1046_s5 = scalar_lea.hbm %s1368_s7, 1024  ;;  %s1050_s23 = scalar_lea.hbm %s1446_s3, 2048 }
 0x195   : > { %p1047_p9 = scmp.ne.s32.totalorder %s1368_s7, %s1046_s5  ;;  %p1051_p5 = scmp.lt.u32.totalorder %s1368_s7, %s1446_s3 }
 0x196   : > { %p1052_p11 = scmp.lt.u32.totalorder %s1050_s23, %s1046_s5  ;;  %p1054_p4 = scmp.lt.u32.totalorder %s1046_s5, %s1368_s7 }
 0x197   : > { %p1048_p1 = pnand %p1047_p9, %p1266_p12 }
 0x198   : > { %p1053_p2 = por %p1052_p11, %p1051_p5 }
 0x199   : > { %p1049_p0 = pneg %p1048_p1 }
 0x19a   : > { %p1055_p6 = por %p1054_p4, %p1053_p2 }
 0x19c   : > { %p1056_p8 = pnand %p1055_p6, %p1049_p0 }
 0x19e   : > { %1059 = shalt.err (!%p1056_p8)
}
 0x19f   : > { %s1144_s28 = smov 64   ;;  %s1145_s29 = smov 4  }
 0x1a0   : > { %911 = dma.vmem_to_hbm [thread:$0]  (%p1266_p12), %s1363_s9, 1024, %s1368_s7, %s542_s26, %s1144_s28, %s1144_s28, %s1145_s29  }
 0x1a1   : > { %s240_s10 = scalar_lea.vmem [#allocation8], %s1317_s11  ;;  %s713_s25 = sshll.u32 %s1193_s19, 4 }
 0x1a2   : > { %s575_s8 = sshll.u32 %s240_s10, 4  ;;  %s1401_s5 = scalar_lea.hbm %s1447_s4, %s713_s25  ;;  %s1396_s8 = int_to_ptr.vmem [resolvable:$true] %s575_s8 }
 0x1a3   : > { %s547_s6 = scalar_lea.sflag [#allocation9], %s1317_s11  ;;  %s1060_s21 = scalar_lea.vmem %s1396_s8, 16 }
 0x1a4   : > { %p1061_p10 = scmp.ne.s32.totalorder %s1396_s8, %s1060_s21  ;;  %s1146_s19 = smov [#allocation8]  }
 0x1a5   : > { %s1064_s9 = sshll.u32 %s1146_s19, 4  ;;  %s1065_s9 = int_to_ptr.vmem [resolvable:$false] %s1064_s9 }
 0x1a6   : > { %p1062_p13 = pnand %p1061_p10, %p1266_p12  ;;  %s1066_s7 = scalar_lea.vmem %s1065_s9, 32 }
 0x1a7   : > { %p1067_p7 = scmp.lt.s32.totalorder %s1396_s8, %s1065_s9  ;;  %p1068_p9 = scmp.lt.s32.totalorder %s1066_s7, %s1060_s21 }
 0x1a8   : > { %p1063_p3 = pneg %p1062_p13 }
 0x1a9   : > { %p1069_p1 = por %p1068_p9, %p1067_p7 }
 0x1ab   : > { %p1070_p0 = pnand %p1069_p1, %p1063_p3 }
 0x265   : > { %v536_v11 = vpop.f32.mrb[0].mxu1 }
 0x266   : > { %540 = vst [vmem:[%s240_s10] sm:$0x1] %v536_v11  ;;  %v880_v12 = vpop.f32.mrb[1].mxu1 }
 0x267   : > { %1073 = shalt.err (!%p1070_p0)
}
 0x268   : > { %s1074_s11 = scalar_lea.hbm %s1401_s5, 16  ;;  %s1078_s12 = scalar_lea.hbm %s1447_s4, 32 }
 0x269   : > { %p1075_p5 = scmp.ne.s32.totalorder %s1401_s5, %s1074_s11  ;;  %p1079_p4 = scmp.lt.u32.totalorder %s1401_s5, %s1447_s4 }
 0x26a   : > { %p1080_p6 = scmp.lt.u32.totalorder %s1078_s12, %s1074_s11  ;;  %p1082_p10 = scmp.lt.u32.totalorder %s1074_s11, %s1401_s5 }
 0x26b   : > { %p1076_p11 = pnand %p1075_p5, %p1266_p12 }
 0x26c   : > { %p1081_p8 = por %p1080_p6, %p1079_p4 }
 0x26d   : > { %p1077_p2 = pneg %p1076_p11 }
 0x26e   : > { %p1083_p13 = por %p1082_p10, %p1081_p8 }
 0x270   : > { %p1084_p3 = pnand %p1083_p13, %p1077_p2 }
 0x272   : > { %1087 = shalt.err (!%p1084_p3)
}
 0x273   : > { %912 = dma.vmem_to_hbm [thread:$0]  (%p1266_p12), %s1396_s8, 16, %s1401_s5, %s547_s6  }
 0x274 PF: > { %s587_s29 = sand.u32 1, %s1122_s15   ;;  %p1462_p7 = scmp.ne.s32.totalorder %s1452_s22, 0 }
 0x275   : > { %p1463_p9 = scmp.ge.s32.totalorder %s1134_s18, 2  ;;  %s588_s10 = scalar_lea.sflag [#allocation4], %s587_s29 }
 0x277   : > { %p924_p1 = pnand %p1463_p9, %p1462_p7 }
 0x279   : > { %1113 = dma.done.wait (!%p924_p1), %s588_s10, 1024  }
 0x27a   : > { %1115 = vsyncadd (!%p924_p1), %s588_s10, 4294966272  ;;  %s597_s25 = scalar_lea.sflag [#allocation9], %s587_s29 }
 0x27b   : > { %1117 = dma.done.wait (!%p924_p1), %s597_s25, 16  }
 0x27c   : > { %1119 = vsyncadd (!%p924_p1), %s597_s25, 4294967280  ;;  %p22_p12 = scmp.ge.s32.totalorder %s1228_s27, 4   ;;  %s1464_s15 = smov %s1126_s16 }
 0x27d   : > { %s1465_s16 = smov %s1130_s17  ;;  %s1466_s17 = smov %s1262_s24 }
 0x27e   : > { %s1467_s18 = smov %s1228_s27  ;;  %24 = sbr.rel (!%p22_p12) target bundleno = 8 (0x8), region = 98 }
 0x285   :  { %601 = vsyncpa [#allocation3], 1 }
 0x286   :  { %603 = vsyncpa [#allocation3 + $0x1], 1 }
 0x287   :  { %604 = vsyncpa [#allocation6], 1 }
 0x288   :  { %605 = vsyncpa [#allocation4], 1 }
 0x289   :  { %607 = vsyncpa [#allocation4 + $0x1], 1 }
 0x28a   :  { %608 = vsyncpa [#allocation9], 1 }
 0x28b   :  { %610 = vsyncpa [#allocation9 + $0x1], 1 }

</bundles_post_ra>
